<compile_context>
chip_gen: v7x
topology: tpu7x:2x2x1
jax: 0.10.0
libtpu: 0.0.40
codegen_flags: <defaults>
</compile_context>

<pallas_src>
import jax
import jax.numpy as jnp
from jax.experimental import pallas as pl
from jax.experimental.pallas import tpu as pltpu

# ---------------- static configuration (small shapes) ----------------
BS = 2                      # batch size
N_AGENTS = 3
N_ALLIES = 2
N_ENEMIES = 4
N_ENTITIES = 1 + N_ALLIES + N_ENEMIES      # 7
OWN_DIM = 8
ALLY_DIM = 6
ENEMY_DIM = 7
HYPER_DIM = 32              # hgap_hyper_dim
RNN_DIM = 16                # rnn_hidden_dim  (HYPER_DIM == 2 * RNN_DIM)
N_HEADS = 1                 # hpn_head_num
N_NORMAL_ACTIONS = 6        # args.output_normal_actions
BA = BS * N_AGENTS          # 6
BA_PAD = 8
Q_DIM = N_NORMAL_ACTIONS + N_ENEMIES
PAD = 8                     # per-type feature slot width (>= max feature dim)
NROWS = BA * N_ENTITIES     # 42 entity rows
NROWS_PAD = 48
XH_ROWS = NROWS_PAD + BA_PAD        # 56: entity rows + hidden-state rows
X_LANES = 4 * PAD                   # 32

assert HYPER_DIM == 2 * RNN_DIM
assert max(OWN_DIM, ALLY_DIM, ENEMY_DIM) <= PAD

# ---------------- constant-slab row layout ----------------
C_WIN = 0                   # 32 rows x 384: [layer-1 block weight (128) | spread matrix (256)]
C_RB = 32                   # 48 rows x 384: [layer-1 bias rows (128)    | layer-2 bias rows (256)]
C_W2F = 80                  # 128 rows x 256: fused layer-2 weight (rows 96:128 zero)
C_WA2 = 208                 # 32 rows x 2:   attention columns [a_i | a_j]
C_MSUM = 240                # 8 rows x 48:   per-sample segment-sum matrix
C_D5 = 248                  # 48 rows x 64:  [ones selector (lane 0) | enemy one-hots (lanes 32:36)]
C_WG = 296                  # 32 rows x 96:  fused GRU weight [[wih,0],[0,whh]]
C_GB = 328                  # 1 row x 96:    [bih | bhh]
C_BQ = 329                  # 1 row x 32:    q_normal bias
C_BM = 330                  # 1 row x 32:    pair-attention scalar bias, lane-replicated
C_WQ = 336                  # 16 rows x 32:  q_normal weight
C_ROWS = 352
C_LANES = 384


# ---------------- Pallas kernel ----------------
def hgap_kernel(xh_ref, c_ref, out_ref):
    HD = HYPER_DIM
    RD = RNN_DIM

    x48 = xh_ref[0:NROWS_PAD, :]                 # (48, 32) entity rows (pad rows zero)
    hx = xh_ref[NROWS_PAD:XH_ROWS, :]            # (8, 32): zeros | h_in at lanes 16:32

    # ---- fused hypernet layer 1: one matmul gives pre-activation (lanes 0:128, lanes
    #      96:128 structurally zero) and the per-row feature spread xb (lanes 128:384) ----
    w_in = c_ref[C_WIN:C_WIN + 32, :]                                        # (32, 384)
    res = jnp.dot(x48, w_in, preferred_element_type=jnp.float32)             # (48, 384)
    rb1 = c_ref[C_RB:C_RB + NROWS_PAD, 0:4 * HD]                             # (48, 128)
    rb2 = c_ref[C_RB:C_RB + NROWS_PAD, 4 * HD:12 * HD]                       # (48, 256)
    hid = jnp.maximum(res[:, 0:4 * HD] + rb1, 0.0)                           # (48, 128)
    xb = res[:, 4 * HD:12 * HD]                                              # (48, 256)

    w2f = c_ref[C_W2F:C_W2F + 4 * HD, 0:8 * HD]                              # (128, 256)
    hw = jnp.dot(hid, w2f, preferred_element_type=jnp.float32) + rb2         # (48, 256)

    # per-sample contraction emb[m,h] = sum_d x[m,d] * W(x)[m,d,h]
    # (multiply fused into the first tree-fold step; full-width product never built)
    y128 = hw[:, 0:4 * HD] * xb[:, 0:4 * HD] + hw[:, 4 * HD:8 * HD] * xb[:, 4 * HD:8 * HD]
    y64 = y128[:, 0:2 * HD] + y128[:, 2 * HD:4 * HD]                         # (48, 64)
    emb = y64[:, 0:HD] + y64[:, HD:2 * HD]                                   # (48, 32) entity embeddings

    # ---- GAT-style pairwise logits, decomposed:  attn[b,i,j] = a_i[row i] + a_j[row j] + bm
    ea = jnp.where(emb > 0, emb, 0.2 * emb)                                  # leaky_relu(0.2)
    aw = jnp.dot(ea, c_ref[C_WA2:C_WA2 + HD, 0:2],
                 preferred_element_type=jnp.float32)                         # (48, 2)
    a_i = aw[:, 0:1]                                                         # (48, 1)
    a_j = aw[:, 1:2]                                                         # (48, 1)
    bm_row = c_ref[C_BM:C_BM + 1, 0:HD]                                      # (1, 32) bm replicated

    # ---- ONE fused segment-sum matmul over entities ----
    d5c = c_ref[C_D5:C_D5 + NROWS_PAD, 0:2 * HD]                             # (48, 64)
    rhs = jnp.concatenate([emb, (a_j + bm_row) * emb, a_i * d5c], axis=-1)   # (48, 128)
    msum = c_ref[C_MSUM:C_MSUM + BA_PAD, 0:NROWS_PAD]                        # (8, 48)
    g = jnp.dot(msum, rhs, preferred_element_type=jnp.float32)               # (8, 128)
    g1 = g[:, 0:HD]                                                          # sum_j ent
    g2 = g[:, HD:2 * HD]                                                     # sum_j (a_j+bm)*ent
    mean_ai = g[:, 2 * HD:2 * HD + 1] * (1.0 / N_ENTITIES)                   # (8, 1)

    # mean_i hout[:, :, :RD] = mean_ai * sum_j ent_lo + sum_j (a_j+bm)*ent_lo   (exact)
    emb_mean32 = mean_ai * g1 + g2                                           # (8, 32); lanes 0:16 real
    x32 = jnp.maximum(emb_mean32, 0.0)

    # ---- GRU cell, gi/gh fused into one block matmul ----
    lane = jax.lax.broadcasted_iota(jnp.int32, (BA_PAD, 2 * RD), 1)
    lhs = jnp.where(lane < RD, x32, hx)                                      # (8, 32): [relu(emb_mean) | h_in]
    wg = c_ref[C_WG:C_WG + 2 * RD, 0:6 * RD]                                 # (32, 96)
    gg = jnp.dot(lhs, wg, preferred_element_type=jnp.float32) \
        + c_ref[C_GB:C_GB + 1, 0:6 * RD]                                     # (8, 96) = [gi | gh]
    rz = jax.nn.sigmoid(gg[:, 0:2 * RD] + gg[:, 3 * RD:5 * RD])              # (8, 32): [r | z]
    r = rz[:, 0:RD]
    z = rz[:, RD:2 * RD]
    nst = jnp.tanh(gg[:, 2 * RD:3 * RD] + r * gg[:, 5 * RD:6 * RD])
    h_in = hx[:, RD:2 * RD]                                                  # (8, 16)
    hh = (1.0 - z) * nst + z * h_in                                          # (8, 16)

    # ---- Q heads ----
    q_normal32 = jnp.dot(hh, c_ref[C_WQ:C_WQ + RD, 0:HD],
                         preferred_element_type=jnp.float32) \
        + c_ref[C_BQ:C_BQ + 1, 0:HD]                                         # (8, 32), lanes 0:6 real
    # q_attack[b,n] = hh[b]·hout[b,3+n,16:] = a_i_enemy*S + T   (exact strength reduction)
    s_vec = jnp.sum(hh * g1[:, RD:2 * RD], axis=-1, keepdims=True)           # (8, 1)
    t_vec = jnp.sum(hh * g2[:, RD:2 * RD], axis=-1, keepdims=True)           # (8, 1)
    q_att32 = g[:, 3 * HD:4 * HD] * s_vec + t_vec                            # (8, 32), lanes 0:4 real

    out_ref[...] = jnp.concatenate(
        [q_normal32, q_att32, hh, jnp.zeros((BA_PAD, 48), jnp.float32)], axis=-1)   # (8, 128)


# ---------------- parameter packing (done once, outside the hot path) ----------------
def pack_params(p):
    f32 = jnp.float32
    HD = HYPER_DIM
    RD = RNN_DIM

    C = jnp.zeros((C_ROWS, C_LANES), f32)

    # fused layer-1 weight, block-diagonal over entity types (lanes 96:128 stay zero)
    w1f = jnp.zeros((4 * PAD, 4 * HD), f32)
    w1f = w1f.at[0:OWN_DIM, 0:HD].set(p['w1o'])
    w1f = w1f.at[PAD:PAD + ALLY_DIM, HD:2 * HD].set(p['w1a'])
    w1f = w1f.at[2 * PAD:2 * PAD + ENEMY_DIM, 2 * HD:3 * HD].set(p['w1e'])
    C = C.at[C_WIN:C_WIN + 4 * PAD, 0:4 * HD].set(w1f)

    # spread matrix: maps the 8 padded per-type features to 8 x 32 lane blocks
    d_idx = jnp.arange(PAD * HD) // HD                                     # (256,)
    rsp = (jnp.arange(PAD)[:, None] == d_idx[None, :]).astype(f32)         # (8, 256)
    rsp = jnp.concatenate([jnp.tile(rsp, (3, 1)),
                           jnp.zeros((PAD, PAD * HD), f32)], axis=0)       # (32, 256)
    C = C.at[C_WIN:C_WIN + 4 * PAD, 4 * HD:12 * HD].set(rsp)

    # per-entity-slot biases, tiled over the agent batch (layer-1 at 0:128, layer-2 at 128:384)
    b1e = jnp.zeros((N_ENTITIES, 4 * HD), f32)
    b1e = b1e.at[0, 0:HD].set(p['b1o'][0])
    b1e = b1e.at[1:1 + N_ALLIES, HD:2 * HD].set(jnp.broadcast_to(p['b1a'][0], (N_ALLIES, HD)))
    b1e = b1e.at[1 + N_ALLIES:, 2 * HD:3 * HD].set(jnp.broadcast_to(p['b1e'][0], (N_ENEMIES, HD)))
    b2e = jnp.zeros((N_ENTITIES, PAD * HD), f32)
    b2e = b2e.at[0, 0:OWN_DIM * HD].set(p['b2o'][0])
    b2e = b2e.at[1:1 + N_ALLIES, 0:ALLY_DIM * HD].set(
        jnp.broadcast_to(p['b2a'][0], (N_ALLIES, ALLY_DIM * HD)))
    b2e = b2e.at[1 + N_ALLIES:, 0:ENEMY_DIM * HD].set(
        jnp.broadcast_to(p['b2e'][0], (N_ENEMIES, ENEMY_DIM * HD)))
    rb = jnp.concatenate([b1e, b2e], axis=1)                               # (7, 384)
    rb = jnp.pad(jnp.tile(rb, (BA, 1)), ((0, NROWS_PAD - NROWS), (0, 0)))  # (48, 384)
    C = C.at[C_RB:C_RB + NROWS_PAD, :].set(rb)

    # fused layer-2 weight, zero-padded to 128 input rows
    w2f = jnp.zeros((4 * HD, PAD * HD), f32)
    w2f = w2f.at[0:HD, 0:OWN_DIM * HD].set(p['w2o'])
    w2f = w2f.at[HD:2 * HD, 0:ALLY_DIM * HD].set(p['w2a'])
    w2f = w2f.at[2 * HD:3 * HD, 0:ENEMY_DIM * HD].set(p['w2e'])
    C = C.at[C_W2F:C_W2F + 4 * HD, 0:PAD * HD].set(w2f)

    # attention columns: col0 -> a_i (acts-as-i half), col1 -> a_j (acts-as-j half)
    wa2 = jnp.stack([p['wm'][0, HD:], p['wm'][0, :HD]], axis=1)            # (32, 2)
    C = C.at[C_WA2:C_WA2 + HD, 0:2].set(wa2)

    # segment-sum matrix over the 48 padded entity rows (8 padded batch rows)
    rows = jnp.arange(NROWS_PAD)
    real = rows < NROWS
    msum = ((jnp.arange(BA_PAD)[:, None] == (rows[None, :] // N_ENTITIES))
            & real[None, :]).astype(f32)                                   # (8, 48)
    C = C.at[C_MSUM:C_MSUM + BA_PAD, 0:NROWS_PAD].set(msum)

    # a_i selector block: lane 0 = ones (sum_i a_i), lanes 32:36 = enemy one-hots
    d5c = jnp.zeros((NROWS_PAD, 2 * HD), f32)
    d5c = d5c.at[:, 0].set(real.astype(f32))
    en_oh = (((rows % N_ENTITIES)[:, None] == (jnp.arange(N_ENEMIES)[None, :] + 1 + N_ALLIES))
             & real[:, None]).astype(f32)                                  # (48, 4)
    d5c = d5c.at[:, HD:HD + N_ENEMIES].set(en_oh)
    C = C.at[C_D5:C_D5 + NROWS_PAD, 0:2 * HD].set(d5c)

    # fused GRU block weight [[wih, 0], [0, whh]] + bias row [bih | bhh]
    wg = jnp.zeros((2 * RD, 6 * RD), f32)
    wg = wg.at[0:RD, 0:3 * RD].set(p['wih'])
    wg = wg.at[RD:2 * RD, 3 * RD:6 * RD].set(p['whh'])
    C = C.at[C_WG:C_WG + 2 * RD, 0:6 * RD].set(wg)
    C = C.at[C_GB, 0:3 * RD].set(p['bih'][0])
    C = C.at[C_GB, 3 * RD:6 * RD].set(p['bhh'][0])

    # q_normal head (lane-padded to 32), its bias, and the lane-replicated bm scalar
    C = C.at[C_WQ:C_WQ + RD, 0:N_NORMAL_ACTIONS].set(p['wq'])
    C = C.at[C_BQ, 0:N_NORMAL_ACTIONS].set(p['bq'][0])
    C = C.at[C_BM, 0:HD].set(jnp.broadcast_to(p['bm'][0, 0], (HD,)))

    return {'consts': C}


# ---------------- wrapper ----------------
def hgap_forward(packed, own_feats, enemy_feats, ally_feats, hidden_state):
    f32 = jnp.float32
    own2 = own_feats.reshape(BA, OWN_DIM).astype(f32)
    ally3 = ally_feats.reshape(BA, N_ALLIES, ALLY_DIM).astype(f32)
    enemy3 = enemy_feats.reshape(BA, N_ENEMIES, ENEMY_DIM).astype(f32)
    h0 = hidden_state.reshape(BA, RNN_DIM).astype(f32)

    # one row per entity, features placed in the type's 8-wide lane slot (32 lanes total)
    own_blk = jnp.pad(own2[:, None, :], ((0, 0), (0, 0), (0, X_LANES - OWN_DIM)))
    ally_blk = jnp.pad(ally3, ((0, 0), (0, 0), (PAD, X_LANES - PAD - ALLY_DIM)))
    enemy_blk = jnp.pad(enemy3, ((0, 0), (0, 0), (2 * PAD, X_LANES - 2 * PAD - ENEMY_DIM)))
    x_rows = jnp.concatenate([own_blk, ally_blk, enemy_blk], axis=1).reshape(NROWS, X_LANES)
    x_rows = jnp.pad(x_rows, ((0, NROWS_PAD - NROWS), (0, 0)))              # (48, 32)

    # hidden state packed into the spare rows, pre-placed at lanes 16:32
    h_rows = jnp.pad(h0, ((0, BA_PAD - BA), (RNN_DIM, 0)))                  # (8, 32)
    xh = jnp.concatenate([x_rows, h_rows], axis=0)                          # (56, 32)

    vmem = pl.BlockSpec(memory_space=pltpu.MemorySpace.VMEM)
    out = pl.pallas_call(
        hgap_kernel,
        out_shape=jax.ShapeDtypeStruct((BA_PAD, 128), jnp.float32),
        in_specs=[vmem, vmem],
        out_specs=vmem,
    )(xh, packed['consts'])

    q = jnp.concatenate([out[:BA, 0:N_NORMAL_ACTIONS],
                         out[:BA, 32:32 + N_ENEMIES]], axis=-1).reshape(BS, N_AGENTS, Q_DIM)
    hh = out[:BA, 64:64 + RNN_DIM].reshape(BS, N_AGENTS, RNN_DIM)
    return q, hh


# ---------------- literal pure-JAX reference (mirrors the PyTorch forward) ----------------
def reference_forward(params, own_feats, enemy_feats, ally_feats, hidden_state):
    def mlp(x, w1, b1, w2, b2):
        h = jnp.maximum(x @ w1 + b1, 0.0)
        return h @ w2 + b2

    own = own_feats.reshape(BA, OWN_DIM)
    ally = ally_feats.reshape(BA * N_ALLIES, ALLY_DIM)
    enemy = enemy_feats.reshape(BA * N_ENEMIES, ENEMY_DIM)
    h0 = hidden_state.reshape(BA, RNN_DIM)

    hw_o = mlp(own, params['w1o'], params['b1o'], params['w2o'], params['b2o']).reshape(BA, OWN_DIM, HYPER_DIM)
    own_emb = jnp.einsum('bd,bdh->bh', own, hw_o)
    hw_a = mlp(ally, params['w1a'], params['b1a'], params['w2a'], params['b2a']).reshape(BA * N_ALLIES, ALLY_DIM, HYPER_DIM)
    ally_emb = jnp.einsum('bd,bdh->bh', ally, hw_a).reshape(BA, N_ALLIES, HYPER_DIM)
    hw_e = mlp(enemy, params['w1e'], params['b1e'], params['w2e'], params['b2e']).reshape(BA * N_ENEMIES, ENEMY_DIM, HYPER_DIM)
    enemy_emb = jnp.einsum('bd,bdh->bh', enemy, hw_e).reshape(BA, N_ENEMIES, HYPER_DIM)

    ent = jnp.concatenate([own_emb[:, None, :], ally_emb, enemy_emb], axis=1)   # (BA, E, HD)
    rep = jnp.tile(ent, (1, N_ENTITIES, 1))              # index e1*E+e2 -> ent[e2]  (torch repeat)
    irep = jnp.repeat(ent, N_ENTITIES, axis=1)           # index e1*E+e2 -> ent[e1]  (repeat_interleave)
    pair = jax.nn.leaky_relu(jnp.concatenate([rep, irep], axis=-1), negative_slope=0.2)
    attn = (pair @ params['wm'][0] + params['bm'][0, 0]).reshape(BA, N_ENTITIES, N_ENTITIES)
    hout = jnp.einsum('bij,bjf->bif', attn, ent)          # Merger(1 head) == identity

    x = jnp.maximum(hout[:, :, :RNN_DIM].mean(axis=1), 0.0)
    gi = x @ params['wih'] + params['bih']
    gh = h0 @ params['whh'] + params['bhh']
    r = jax.nn.sigmoid(gi[:, :RNN_DIM] + gh[:, :RNN_DIM])
    z = jax.nn.sigmoid(gi[:, RNN_DIM:2 * RNN_DIM] + gh[:, RNN_DIM:2 * RNN_DIM])
    nst = jnp.tanh(gi[:, 2 * RNN_DIM:] + r * gh[:, 2 * RNN_DIM:])
    hh = (1.0 - z) * nst + z * h0

    q_normal = hh @ params['wq'] + params['bq']
    act = hout[:, -N_ENEMIES:, RNN_DIM:]                  # (BA, NE, RNN_DIM)
    q_attack = jnp.einsum('br,bnr->bn', hh, act)
    q = jnp.concatenate([q_normal, q_attack], axis=-1)
    return q.reshape(BS, N_AGENTS, Q_DIM), hh.reshape(BS, N_AGENTS, RNN_DIM)


# ---------------- deterministic parameter init ----------------
def init_params(key):
    def lin(k, din, dout):
        k1, k2 = jax.random.split(k)
        s = 1.0 / jnp.sqrt(jnp.float32(din))
        w = jax.random.uniform(k1, (din, dout), jnp.float32, -s, s)
        b = jax.random.uniform(k2, (1, dout), jnp.float32, -s, s)
        return w, b

    ks = jax.random.split(key, 10)
    p = {}
    p['w1o'], p['b1o'] = lin(ks[0], OWN_DIM, HYPER_DIM)
    p['w2o'], p['b2o'] = lin(ks[1], HYPER_DIM, OWN_DIM * HYPER_DIM * N_HEADS)
    p['w1a'], p['b1a'] = lin(ks[2], ALLY_DIM, HYPER_DIM)
    p['w2a'], p['b2a'] = lin(ks[3], HYPER_DIM, ALLY_DIM * HYPER_DIM * N_HEADS)
    p['w1e'], p['b1e'] = lin(ks[4], ENEMY_DIM, HYPER_DIM)
    p['w2e'], p['b2e'] = lin(ks[5], HYPER_DIM, ENEMY_DIM * HYPER_DIM * N_HEADS)
    wm, bm = lin(ks[6], 2 * HYPER_DIM, 1)
    p['wm'], p['bm'] = wm.T, bm.reshape(1, 1)            # (1, 2*HD), (1, 1)
    p['wih'], p['bih'] = lin(ks[7], RNN_DIM, 3 * RNN_DIM)
    p['whh'], p['bhh'] = lin(ks[8], RNN_DIM, 3 * RNN_DIM)
    p['wq'], p['bq'] = lin(ks[9], RNN_DIM, N_NORMAL_ACTIONS)
    return p


if __name__ == "__main__":
    key = jax.random.PRNGKey(0)
    kp, k1, k2, k3, k4 = jax.random.split(key, 5)
    params = init_params(kp)
    packed = pack_params(params)          # done once, outside the per-step path

    own_feats = jax.random.normal(k1, (BS, N_AGENTS, OWN_DIM), jnp.float32)
    enemy_feats = jax.random.normal(k2, (BS, N_AGENTS, N_ENEMIES, ENEMY_DIM), jnp.float32)
    ally_feats = jax.random.normal(k3, (BS, N_AGENTS, N_ALLIES, ALLY_DIM), jnp.float32)
    hidden_state = 0.1 * jax.random.normal(k4, (BS, N_AGENTS, RNN_DIM), jnp.float32)

    q, hh = hgap_forward(packed, own_feats, enemy_feats, ally_feats, hidden_state)
    q, hh = jax.block_until_ready((q, hh))

    q_ref, hh_ref = reference_forward(params, own_feats, enemy_feats, ally_feats, hidden_state)
    assert q.shape == (BS, N_AGENTS, Q_DIM) and hh.shape == (BS, N_AGENTS, RNN_DIM)
    assert jnp.allclose(q, q_ref, rtol=1e-3, atol=1e-3), "q mismatch vs reference"
    assert jnp.allclose(hh, hh_ref, rtol=1e-3, atol=1e-3), "hh mismatch vs reference"

    print("KERNEL_OK")
</pallas_src>

<mosaic_0001>
module attributes {stable_mosaic.version = 11 : i64} {
  func.func @hgap_kernel(%arg0: memref<56x32xf32, #tpu.memory_space<vmem>>, %arg1: memref<352x384xf32, #tpu.memory_space<vmem>>, %arg2: memref<8x128xf32, #tpu.memory_space<vmem>>) attributes {dimension_semantics = [], scalar_prefetch = 0 : i64, scratch_operands = 0 : i64, tpu.core_type = #tpu.core_type<tc>} {
    %c0 = arith.constant 0 : index
    %c0_0 = arith.constant 0 : index
    %0 = vector.load %arg0[%c0, %c0_0] : memref<56x32xf32, #tpu.memory_space<vmem>>, vector<48x32xf32>
    %c48 = arith.constant 48 : index
    %c0_1 = arith.constant 0 : index
    %1 = vector.load %arg0[%c48, %c0_1] : memref<56x32xf32, #tpu.memory_space<vmem>>, vector<8x32xf32>
    %c0_2 = arith.constant 0 : index
    %c0_3 = arith.constant 0 : index
    %2 = vector.load %arg1[%c0_2, %c0_3] : memref<352x384xf32, #tpu.memory_space<vmem>>, vector<32x384xf32>
    %cst = arith.constant dense<0.000000e+00> : vector<48x384xf32>
    %3 = tpu.matmul %0, %2, %cst {dimension_numbers = #tpu.dot_dimension_numbers<[1], [0], [0], [1], [0, 0, 1, 1], [], []>} : vector<48x32xf32>, vector<32x384xf32>, vector<48x384xf32> -> vector<48x384xf32>
    %c32 = arith.constant 32 : index
    %c0_4 = arith.constant 0 : index
    %4 = vector.load %arg1[%c32, %c0_4] : memref<352x384xf32, #tpu.memory_space<vmem>>, vector<48x128xf32>
    %c32_5 = arith.constant 32 : index
    %c128 = arith.constant 128 : index
    %5 = vector.load %arg1[%c32_5, %c128] : memref<352x384xf32, #tpu.memory_space<vmem>>, vector<48x256xf32>
    %6 = vector.extract_strided_slice %3 {offsets = [0, 0], sizes = [48, 128], strides = [1, 1]} : vector<48x384xf32> to vector<48x128xf32>
    %7 = arith.addf %6, %4 : vector<48x128xf32>
    %cst_6 = arith.constant 0.000000e+00 : f32
    %8 = vector.broadcast %cst_6 : f32 to vector<48x128xf32>
    %9 = arith.maximumf %7, %8 : vector<48x128xf32>
    %10 = vector.extract_strided_slice %3 {offsets = [0, 128], sizes = [48, 256], strides = [1, 1]} : vector<48x384xf32> to vector<48x256xf32>
    %c80 = arith.constant 80 : index
    %c0_7 = arith.constant 0 : index
    %11 = vector.load %arg1[%c80, %c0_7] : memref<352x384xf32, #tpu.memory_space<vmem>>, vector<128x256xf32>
    %cst_8 = arith.constant dense<0.000000e+00> : vector<48x256xf32>
    %12 = tpu.matmul %9, %11, %cst_8 {dimension_numbers = #tpu.dot_dimension_numbers<[1], [0], [0], [1], [0, 0, 1, 1], [], []>} : vector<48x128xf32>, vector<128x256xf32>, vector<48x256xf32> -> vector<48x256xf32>
    %13 = arith.addf %12, %5 : vector<48x256xf32>
    %14 = vector.extract_strided_slice %13 {offsets = [0, 0], sizes = [48, 128], strides = [1, 1]} : vector<48x256xf32> to vector<48x128xf32>
    %15 = vector.extract_strided_slice %10 {offsets = [0, 0], sizes = [48, 128], strides = [1, 1]} : vector<48x256xf32> to vector<48x128xf32>
    %16 = arith.mulf %14, %15 : vector<48x128xf32>
    %17 = vector.extract_strided_slice %13 {offsets = [0, 128], sizes = [48, 128], strides = [1, 1]} : vector<48x256xf32> to vector<48x128xf32>
    %18 = vector.extract_strided_slice %10 {offsets = [0, 128], sizes = [48, 128], strides = [1, 1]} : vector<48x256xf32> to vector<48x128xf32>
    %19 = arith.mulf %17, %18 : vector<48x128xf32>
    %20 = arith.addf %16, %19 : vector<48x128xf32>
    %21 = vector.extract_strided_slice %20 {offsets = [0, 0], sizes = [48, 64], strides = [1, 1]} : vector<48x128xf32> to vector<48x64xf32>
    %22 = vector.extract_strided_slice %20 {offsets = [0, 64], sizes = [48, 64], strides = [1, 1]} : vector<48x128xf32> to vector<48x64xf32>
    %23 = arith.addf %21, %22 : vector<48x64xf32>
    %24 = vector.extract_strided_slice %23 {offsets = [0, 0], sizes = [48, 32], strides = [1, 1]} : vector<48x64xf32> to vector<48x32xf32>
    %25 = vector.extract_strided_slice %23 {offsets = [0, 32], sizes = [48, 32], strides = [1, 1]} : vector<48x64xf32> to vector<48x32xf32>
    %26 = arith.addf %24, %25 : vector<48x32xf32>
    %cst_9 = arith.constant 0.000000e+00 : f32
    %27 = vector.broadcast %cst_9 : f32 to vector<48x32xf32>
    %28 = arith.cmpf ogt, %26, %27 : vector<48x32xf32>
    %cst_10 = arith.constant 2.000000e-01 : f32
    %29 = vector.broadcast %cst_10 : f32 to vector<48x32xf32>
    %30 = arith.mulf %29, %26 : vector<48x32xf32>
    %31 = arith.select %28, %26, %30 : vector<48x32xi1>, vector<48x32xf32>
    %c208 = arith.constant 208 : index
    %c0_11 = arith.constant 0 : index
    %32 = vector.load %arg1[%c208, %c0_11] : memref<352x384xf32, #tpu.memory_space<vmem>>, vector<32x2xf32>
    %cst_12 = arith.constant dense<0.000000e+00> : vector<48x2xf32>
    %33 = tpu.matmul %31, %32, %cst_12 {dimension_numbers = #tpu.dot_dimension_numbers<[1], [0], [0], [1], [0, 0, 1, 1], [], []>} : vector<48x32xf32>, vector<32x2xf32>, vector<48x2xf32> -> vector<48x2xf32>
    %34 = vector.extract_strided_slice %33 {offsets = [0, 0], sizes = [48, 1], strides = [1, 1]} : vector<48x2xf32> to vector<48x1xf32>
    %35 = vector.extract_strided_slice %33 {offsets = [0, 1], sizes = [48, 1], strides = [1, 1]} : vector<48x2xf32> to vector<48x1xf32>
    %c330 = arith.constant 330 : index
    %c0_13 = arith.constant 0 : index
    %36 = vector.load %arg1[%c330, %c0_13] : memref<352x384xf32, #tpu.memory_space<vmem>>, vector<1x32xf32>
    %c248 = arith.constant 248 : index
    %c0_14 = arith.constant 0 : index
    %37 = vector.load %arg1[%c248, %c0_14] : memref<352x384xf32, #tpu.memory_space<vmem>>, vector<48x64xf32>
    %38 = vector.broadcast %35 : vector<48x1xf32> to vector<48x32xf32>
    %39 = vector.broadcast %36 : vector<1x32xf32> to vector<48x32xf32>
    %40 = arith.addf %38, %39 : vector<48x32xf32>
    %41 = arith.mulf %40, %26 : vector<48x32xf32>
    %42 = vector.broadcast %34 : vector<48x1xf32> to vector<48x64xf32>
    %43 = arith.mulf %42, %37 : vector<48x64xf32>
    %44 = tpu.concatenate %26, %41, %43 in 1 : vector<48x32xf32>, vector<48x32xf32>, vector<48x64xf32> -> vector<48x128xf32>
    %c240 = arith.constant 240 : index
    %c0_15 = arith.constant 0 : index
    %45 = vector.load %arg1[%c240, %c0_15] : memref<352x384xf32, #tpu.memory_space<vmem>>, vector<8x48xf32>
    %cst_16 = arith.constant dense<0.000000e+00> : vector<8x128xf32>
    %46 = tpu.matmul %45, %44, %cst_16 {dimension_numbers = #tpu.dot_dimension_numbers<[1], [0], [0], [1], [0, 0, 1, 1], [], []>} : vector<8x48xf32>, vector<48x128xf32>, vector<8x128xf32> -> vector<8x128xf32>
    %47 = vector.extract_strided_slice %46 {offsets = [0, 0], sizes = [8, 32], strides = [1, 1]} : vector<8x128xf32> to vector<8x32xf32>
    %48 = vector.extract_strided_slice %46 {offsets = [0, 32], sizes = [8, 32], strides = [1, 1]} : vector<8x128xf32> to vector<8x32xf32>
    %49 = vector.extract_strided_slice %46 {offsets = [0, 64], sizes = [8, 1], strides = [1, 1]} : vector<8x128xf32> to vector<8x1xf32>
    %cst_17 = arith.constant 0.142857149 : f32
    %50 = vector.broadcast %cst_17 : f32 to vector<8x1xf32>
    %51 = arith.mulf %49, %50 : vector<8x1xf32>
    %52 = vector.broadcast %51 : vector<8x1xf32> to vector<8x32xf32>
    %53 = arith.mulf %52, %47 : vector<8x32xf32>
    %54 = arith.addf %53, %48 : vector<8x32xf32>
    %cst_18 = arith.constant 0.000000e+00 : f32
    %55 = vector.broadcast %cst_18 : f32 to vector<8x32xf32>
    %56 = arith.maximumf %54, %55 : vector<8x32xf32>
    %57 = tpu.iota {dimensions = array<i32: 1>} : vector<8x32xi32>
    %c16_i32 = arith.constant 16 : i32
    %58 = vector.broadcast %c16_i32 : i32 to vector<8x32xi32>
    %59 = arith.cmpi slt, %57, %58 : vector<8x32xi32>
    %60 = arith.select %59, %56, %1 : vector<8x32xi1>, vector<8x32xf32>
    %c296 = arith.constant 296 : index
    %c0_19 = arith.constant 0 : index
    %61 = vector.load %arg1[%c296, %c0_19] : memref<352x384xf32, #tpu.memory_space<vmem>>, vector<32x96xf32>
    %cst_20 = arith.constant dense<0.000000e+00> : vector<8x96xf32>
    %62 = tpu.matmul %60, %61, %cst_20 {dimension_numbers = #tpu.dot_dimension_numbers<[1], [0], [0], [1], [0, 0, 1, 1], [], []>} : vector<8x32xf32>, vector<32x96xf32>, vector<8x96xf32> -> vector<8x96xf32>
    %c328 = arith.constant 328 : index
    %c0_21 = arith.constant 0 : index
    %63 = vector.load %arg1[%c328, %c0_21] : memref<352x384xf32, #tpu.memory_space<vmem>>, vector<1x96xf32>
    %64 = vector.broadcast %63 : vector<1x96xf32> to vector<8x96xf32>
    %65 = arith.addf %62, %64 : vector<8x96xf32>
    %66 = vector.extract_strided_slice %65 {offsets = [0, 0], sizes = [8, 32], strides = [1, 1]} : vector<8x96xf32> to vector<8x32xf32>
    %67 = vector.extract_strided_slice %65 {offsets = [0, 48], sizes = [8, 32], strides = [1, 1]} : vector<8x96xf32> to vector<8x32xf32>
    %68 = arith.addf %66, %67 : vector<8x32xf32>
    %69 = arith.negf %68 : vector<8x32xf32>
    %70 = math.exp %69 : vector<8x32xf32>
    %cst_22 = arith.constant 1.000000e+00 : f32
    %71 = vector.broadcast %cst_22 : f32 to vector<8x32xf32>
    %72 = arith.addf %71, %70 : vector<8x32xf32>
    %73 = arith.divf %71, %72 : vector<8x32xf32>
    %74 = vector.extract_strided_slice %73 {offsets = [0, 0], sizes = [8, 16], strides = [1, 1]} : vector<8x32xf32> to vector<8x16xf32>
    %75 = vector.extract_strided_slice %73 {offsets = [0, 16], sizes = [8, 16], strides = [1, 1]} : vector<8x32xf32> to vector<8x16xf32>
    %76 = vector.extract_strided_slice %65 {offsets = [0, 32], sizes = [8, 16], strides = [1, 1]} : vector<8x96xf32> to vector<8x16xf32>
    %77 = vector.extract_strided_slice %65 {offsets = [0, 80], sizes = [8, 16], strides = [1, 1]} : vector<8x96xf32> to vector<8x16xf32>
    %78 = arith.mulf %74, %77 : vector<8x16xf32>
    %79 = arith.addf %76, %78 : vector<8x16xf32>
    %80 = math.tanh %79 : vector<8x16xf32>
    %81 = vector.extract_strided_slice %1 {offsets = [0, 16], sizes = [8, 16], strides = [1, 1]} : vector<8x32xf32> to vector<8x16xf32>
    %cst_23 = arith.constant 1.000000e+00 : f32
    %82 = vector.broadcast %cst_23 : f32 to vector<8x16xf32>
    %83 = arith.subf %82, %75 : vector<8x16xf32>
    %84 = arith.mulf %83, %80 : vector<8x16xf32>
    %85 = arith.mulf %75, %81 : vector<8x16xf32>
    %86 = arith.addf %84, %85 : vector<8x16xf32>
    %c336 = arith.constant 336 : index
    %c0_24 = arith.constant 0 : index
    %87 = vector.load %arg1[%c336, %c0_24] : memref<352x384xf32, #tpu.memory_space<vmem>>, vector<16x32xf32>
    %cst_25 = arith.constant dense<0.000000e+00> : vector<8x32xf32>
    %88 = tpu.matmul %86, %87, %cst_25 {dimension_numbers = #tpu.dot_dimension_numbers<[1], [0], [0], [1], [0, 0, 1, 1], [], []>} : vector<8x16xf32>, vector<16x32xf32>, vector<8x32xf32> -> vector<8x32xf32>
    %c329 = arith.constant 329 : index
    %c0_26 = arith.constant 0 : index
    %89 = vector.load %arg1[%c329, %c0_26] : memref<352x384xf32, #tpu.memory_space<vmem>>, vector<1x32xf32>
    %90 = vector.broadcast %89 : vector<1x32xf32> to vector<8x32xf32>
    %91 = arith.addf %88, %90 : vector<8x32xf32>
    %92 = vector.extract_strided_slice %47 {offsets = [0, 16], sizes = [8, 16], strides = [1, 1]} : vector<8x32xf32> to vector<8x16xf32>
    %93 = arith.mulf %86, %92 : vector<8x16xf32>
    %cst_27 = arith.constant dense<0.000000e+00> : vector<8xf32>
    %94 = vector.multi_reduction <add>, %93, %cst_27 [1] : vector<8x16xf32> to vector<8xf32>
    %95 = vector.shape_cast %94 : vector<8xf32> to vector<8x1xf32>
    %96 = vector.extract_strided_slice %48 {offsets = [0, 16], sizes = [8, 16], strides = [1, 1]} : vector<8x32xf32> to vector<8x16xf32>
    %97 = arith.mulf %86, %96 : vector<8x16xf32>
    %cst_28 = arith.constant dense<0.000000e+00> : vector<8xf32>
    %98 = vector.multi_reduction <add>, %97, %cst_28 [1] : vector<8x16xf32> to vector<8xf32>
    %99 = vector.shape_cast %98 : vector<8xf32> to vector<8x1xf32>
    %100 = vector.extract_strided_slice %46 {offsets = [0, 96], sizes = [8, 32], strides = [1, 1]} : vector<8x128xf32> to vector<8x32xf32>
    %101 = vector.broadcast %95 : vector<8x1xf32> to vector<8x32xf32>
    %102 = arith.mulf %100, %101 : vector<8x32xf32>
    %103 = vector.broadcast %99 : vector<8x1xf32> to vector<8x32xf32>
    %104 = arith.addf %102, %103 : vector<8x32xf32>
    %cst_29 = arith.constant 0.000000e+00 : f32
    %105 = vector.broadcast %cst_29 : f32 to vector<8x48xf32>
    %106 = tpu.concatenate %91, %104, %86, %105 in 1 : vector<8x32xf32>, vector<8x32xf32>, vector<8x16xf32>, vector<8x48xf32> -> vector<8x128xf32>
    %c0_30 = arith.constant 0 : index
    %c0_31 = arith.constant 0 : index
    %107 = vector.load %arg2[%c0_30, %c0_31] : memref<8x128xf32, #tpu.memory_space<vmem>>, vector<8x128xf32>
    tpu.vector_store %arg2[%c0_30, %c0_31], %106 {strides = array<i32>} : memref<8x128xf32, #tpu.memory_space<vmem>>, vector<8x128xf32>,
    return
  }
}

</mosaic_0001>

<bundles_post_ra>
// kernel: tpu_custom_call.1
= control target key start
LH: loop header
LB: loop body
LE: loop exit
PB: predicated region body
PF: predicated region fallthrough
CT: control target
= control target key end

     0   :  { %7 = vsyncpa [#allocation3], 0  ;;  %s1633_s0 = inlined_call_operand.vmem [shape: f32[56,32], index: 0, kind: input, shape index: {}]   ;;  %s1634_s1 = inlined_call_operand.hbm [shape: f32[352,384], index: 1, kind: input, shape index: {}]   ;;  %s1635_s2 = inlined_call_operand.hbm [shape: f32[8,128], index: 2, kind: output, shape index: {}]  }
   0x1   :  { %8 = vsyncpa [#allocation4], 0  ;;  %s1409_s9 = smov [#allocation2]   ;;  %s1361_s13 = scalar_lea.hbm %s1634_s1, 16896 }
   0x2   :  { %s16_s10 = sshll.u32 %s1409_s9, 4  ;;  %p1362_p0 = scmp.ne.s32.totalorder %s1634_s1, %s1361_s13  ;;  %s17_s10 = int_to_ptr.vmem [resolvable:$true] %s16_s10 }
   0x3   :  { %p1365_p1 = scmp.lt.u32.totalorder %s1361_s13, %s1634_s1 }
   0x5   :  { %p1367_p2 = pnand %p1365_p1, %p1362_p0 }
   0x7   :  { %1370 = shalt.err (!%p1367_p2)
}
   0x8   :  { %s1371_s18 = scalar_lea.vmem %s17_s10, 16896  ;;  %p1376_p4 = scmp.lt.s32.totalorder %s17_s10, %s17_s10 }
   0x9   :  { %p1372_p3 = scmp.ne.s32.totalorder %s17_s10, %s1371_s18  ;;  %p1377_p5 = scmp.lt.s32.totalorder %s1371_s18, %s1371_s18 }
   0xb   :  { %p1378_p6 = por %p1377_p5, %p1376_p4 }
   0xd   :  { %p1379_p7 = pnand %p1378_p6, %p1372_p3 }
   0xf   :  { %1382 = shalt.err (!%p1379_p7)
}
  0x10   :  { %s1410_s19 = smov 384   ;;  %s1411_s20 = smov 24  }
  0x11   :  { %22 = dma.hbm_to_vmem [thread:$0]  %s1634_s1, 16896, %s17_s10, [#allocation3], %s1410_s19, %s1410_s19, %s1411_s20  }
  0x12   :  { %1405 = dma.done.wait [#allocation3], 16896  }
  0x13   :  { %1406 = vsyncadd [#allocation3], 4294950400  ;;  %v1412_v0 = vmov 0.0   ;;  %v34_v1 = vld [vmem:[#allocation2 + $0x8] sm:$0xff]  ;;  %v37_v2 = vld [vmem:[#allocation2 + $0x20] sm:$0xff]  ;;  %vm45_vm0 = vcmask 261120  }
  0x14   :  { %128 = vmatprep.mubr.f32.mxu0 %v1412_v0  ;;  %v33_v3 = vld [vmem:[#allocation2] sm:$0xff]  ;;  %v1223_v4 = vpack.c.bf16 %v37_v2, %v34_v1  ;;  %v36_v5 = vld [vmem:[#allocation2 + $0x18] sm:$0xff]  ;;  %v43_v7 = vld [vmem:[#allocation2 + $0x50] sm:$0xff]  ;;  %s1413_s6 = smov 64   ;;  %s1414_s7 = smov 96   ;;  %vm1419_vm7 = vmmov 0  }
  0x15   :  { %v40_v6 = vld [vmem:[#allocation2 + $0x38] sm:$0xff]  ;;  %v1225_v8 = vpack.c.bf16 %v36_v5, %v33_v3  ;;  %v39_v10 = vld [vmem:[#allocation2 + $0x30] sm:$0xff]  ;;  %v42_v11 = vld [vmem:[#allocation2 + $0x48] sm:$0xff]  ;;  %s1418_s8 = smov 32   ;;  %vm769_vm8 = vcmask 523264   ;;  %vm777_vm9 = vcmask 392192  }
  0x16   :  { %v1227_v9 = vpack.c.bf16 %v43_v7, %v40_v6  ;;  %v26_v12 = vld [vmem:[%s1633_s0] sm:$0xff]  ;;  %1224 = vmatprep.subr.bf16.mxu0 %v1223_v4  ;;  %v1229_v13 = vpack.c.bf16 %v42_v11, %v39_v10  ;;  %v291_v14 = vld [vmem:[#allocation2 + $0xf8] sm:$0xff]  ;;  %v293_v15 = vld [vmem:[#allocation2 + $0x110] sm:$0xff]  ;;  %s1421_s11 = smov 48   ;;  %s1422_s12 = smov 80   ;;  %vm981_vm11 = vcmask 130048  }
  0x17   :  { %1164 = vmatprep.mubr.msk.f32.mxu1 %vm45_vm0, %v26_v12  ;;  %1226 = vmatpush1.bf16.msra.mxu0 %v1225_v8  ;;  %v290_v16 = vld [vmem:[#allocation2 + $0xf0] sm:$0xff]  ;;  %v292_v17 = vld [vmem:[#allocation2 + $0x108] sm:$0xff]  ;;  %v1239_v18 = vpack.c.bf16 %v293_v15, %v291_v14  ;;  %v297_v20 = vld [vmem:[#allocation2 + $0x140] sm:$0xff]  ;;  %s1424_s13 = smov [#allocation5]   ;;  %vm1081_vm12 = vcmask 654336  }
  0x18   :  { %1228 = vmatprep.subr.bf16.mxu0 %v1227_v9  ;;  %v295_v19 = vld [vmem:[#allocation2 + $0x128] sm:$0xff]  ;;  %v1241_v21 = vpack.c.bf16 %v292_v17, %v290_v16  ;;  %v294_v23 = vld [vmem:[#allocation2 + $0x120] sm:$0xff]  ;;  %v296_v24 = vld [vmem:[#allocation2 + $0x138] sm:$0xff]  ;;  %s1090_s14 = sshll.u32 %s1424_s13, 4  ;;  %s1091_s14 = int_to_ptr.vmem [resolvable:$true] %s1090_s14 }
  0x19   :  { %v1243_v22 = vpack.c.bf16 %v297_v20, %v295_v19  ;;  %v299_v25 = vld [vmem:[#allocation2 + $0x158] sm:$0xff]  ;;  %v301_v26 = vld [vmem:[#allocation2 + $0x170] sm:$0xff]  ;;  %v1462_v27 = vld [vmem:[%s1633_s0 + $0x8] sm:$0xff]  ;;  %v1245_v28 = vpack.c.bf16 %v296_v24, %v294_v23  ;;  %s1383_s15 = scalar_lea.vmem %s1091_s14, 128  ;;  %p1388_p9 = scmp.lt.s32.totalorder %s1091_s14, %s1091_s14 }
  0x1a   :  { %v298_v29 = vld [vmem:[#allocation2 + $0x150] sm:$0xff]  ;;  %v1247_v30 = vpack.c.bf16 %v301_v26, %v299_v25  ;;  %v300_v31 = vld [vmem:[#allocation2 + $0x168] sm:$0xff]  ;;  %v305_v35 = vld [vmem:[#allocation2 + $0x1a0] sm:$0xff]  ;;  %p1384_p8 = scmp.ne.s32.totalorder %s1091_s14, %s1383_s15  ;;  %p1389_p10 = scmp.lt.s32.totalorder %s1383_s15, %s1383_s15 }
  0x1b   :  { %1230 = vmatpush1.bf16.msra.mxu0 %v1229_v13  ;;  %v35_v32 = vld [vmem:[#allocation2 + $0x10] sm:$0xff]  ;;  %v38_v33 = vld [vmem:[#allocation2 + $0x28] sm:$0xff]  ;;  %v1249_v38 = vpack.c.bf16 %v300_v31, %v298_v29  ;;  %v302_v40 = vld [vmem:[#allocation2 + $0x180] sm:$0xff] }
  0x1c   :  { %1240 = vmatprep.subr.bf16.mxu0 %v1239_v18  ;;  %v303_v34 = vld [vmem:[#allocation2 + $0x188] sm:$0xff]  ;;  %v1231_v36 = vpack.c.bf16 %v38_v33, %v35_v32  ;;  %v28_v37 = vld [vmem:[%s1633_s0 + $0x10] sm:$0xff]  ;;  %v304_v41 = vld [vmem:[#allocation2 + $0x198] sm:$0xff]  ;;  %p1390_p11 = por %p1389_p10, %p1388_p9 }
  0x1d   :  { %v1251_v39 = vpack.c.bf16 %v305_v35, %v303_v34  ;;  %v307_v42 = vld [vmem:[#allocation2 + $0x1b8] sm:$0xff]  ;;  %v309_v43 = vld [vmem:[#allocation2 + $0x1d0] sm:$0xff]  ;;  %v1253_v45 = vpack.c.bf16 %v304_v41, %v302_v40  ;;  %v308_v48 = vld [vmem:[#allocation2 + $0x1c8] sm:$0xff] }
  0x1e   :  { %1099 = vmatmul.mubr.msk.f32.vlgmr.msra.gmra.mrb[0].mxu0 %vm45_vm0, %v26_v12  ;;  %1232 = vmatprep.subr.bf16.mxu1 %v1231_v36  ;;  %v29_v44 = vld [vmem:[%s1633_s0 + $0x18] sm:$0xff]  ;;  %v1255_v46 = vpack.c.bf16 %v309_v43, %v307_v42  ;;  %v306_v47 = vld [vmem:[#allocation2 + $0x1b0] sm:$0xff]  ;;  %v311_v49 = vld [vmem:[#allocation2 + $0x1e8] sm:$0xff]  ;;  %p1391_p12 = pnand %p1390_p11, %p1384_p8 }
  0x1f   :  { %134 = vmatprep.mubr.f32.mxu0 %v1412_v0  ;;  %1242 = vmatpush1.bf16.msra.mxu0 %v1241_v21  ;;  %v313_v50 = vld [vmem:[#allocation2 + $0x200] sm:$0xff]  ;;  %v1257_v52 = vpack.c.bf16 %v308_v48, %v306_v47  ;;  %v312_v55 = vld [vmem:[#allocation2 + $0x1f8] sm:$0xff]  ;;  %v317_v57 = vld [vmem:[#allocation2 + $0x230] sm:$0xff] }
  0x20   :  { %1244 = vmatprep.subr.bf16.mxu0 %v1243_v22  ;;  %1234 = vmatpush3.bf16.msra.mxu1 %v1231_v36  ;;  %v30_v51 = vld [vmem:[%s1633_s0 + $0x20] sm:$0xff]  ;;  %v1259_v53 = vpack.c.bf16 %v313_v50, %v311_v49  ;;  %v315_v56 = vld [vmem:[#allocation2 + $0x218] sm:$0xff]  ;;  %v31_v58 = vld [vmem:[%s1633_s0 + $0x28] sm:$0xff] }
  0x21   :  { %v310_v54 = vld [vmem:[#allocation2 + $0x1e0] sm:$0xff]  ;;  %v1263_v60 = vpack.c.bf16 %v317_v57, %v315_v56  ;;  %v314_v61 = vld [vmem:[#allocation2 + $0x210] sm:$0xff]  ;;  %v316_v62 = vld [vmem:[#allocation2 + $0x228] sm:$0xff] }
  0x22   :  { %1100 = vmatmul.mubr.msk.f32.gmra.mrb[2].mxu0 %vm45_vm0, %v1462_v27  ;;  %v1261_v59 = vpack.c.bf16 %v312_v55, %v310_v54  ;;  %v1265_v63 = vpack.c.bf16 %v316_v62, %v314_v61  ;;  %v319_v1 = vld [vmem:[#allocation2 + $0x248] sm:$0xff]  ;;  %v321_v2 = vld [vmem:[#allocation2 + $0x260] sm:$0xff]  ;;  %v44_v5 = vld [vmem:[#allocation2 + $0x58] sm:$0xff] }
  0x23   :  { %140 = vmatprep.mubr.f32.mxu0 %v1412_v0  ;;  %1246 = vmatpush1.bf16.msra.mxu0 %v1245_v28  ;;  %v1267_v3 = vpack.c.bf16 %v321_v2, %v319_v1  ;;  %v41_v4 = vld [vmem:[#allocation2 + $0x40] sm:$0xff]  ;;  %v320_v8 = vld [vmem:[#allocation2 + $0x258] sm:$0xff]  ;;  %v262_v19 = vld [vmem:[#allocation2 + $0x90] sm:$0xff] }
  0x24   :  { %1248 = vmatprep.subr.bf16.mxu0 %v1247_v30  ;;  %v318_v6 = vld [vmem:[#allocation2 + $0x240] sm:$0xff]  ;;  %v1235_v7 = vpack.c.bf16 %v44_v5, %v41_v4  ;;  %v261_v14 = vld [vmem:[#allocation2 + $0x78] sm:$0xff]  ;;  %v263_v24 = vld [vmem:[#allocation2 + $0xa8] sm:$0xff] }
  0x25   :  { %v1269_v9 = vpack.c.bf16 %v320_v8, %v318_v6  ;;  %v260_v10 = vld [vmem:[#allocation2 + $0x60] sm:$0xff]  ;;  %v265_v34 = vld [vmem:[#allocation2 + $0xd8] sm:$0xff]  ;;  %v267_v47 = vld [vmem:[#allocation2 + $0x70] sm:$0xff] }
  0x26   :  { %1101 = vmatmul.mubr.msk.f32.gmra.mrb[4].mxu0 %vm45_vm0, %v28_v37  ;;  %1236 = vmatprep.subr.bf16.mxu1 %v1235_v7  ;;  %v264_v29 = vld [vmem:[#allocation2 + $0xc0] sm:$0xff]  ;;  %v269_v54 = vld [vmem:[#allocation2 + $0x88] sm:$0xff]  ;;  %v272_v6 = vld [vmem:[#allocation2 + $0xb0] sm:$0xff] }
  0x27   :  { %146 = vmatprep.mubr.f32.mxu0 %v1412_v0  ;;  %1250 = vmatpush1.bf16.msra.mxu0 %v1249_v38 }
  0x28   :  { %1252 = vmatprep.subr.bf16.mxu0 %v1251_v39  ;;  %1238 = vmatpush3.bf16.msra.mxu1 %v1235_v7 }
  0x2a   :  { %1102 = vmatmul.mubr.msk.f32.gmra.mrb[6].mxu0 %vm45_vm0, %v29_v44 }
  0x2b   :  { %152 = vmatprep.mubr.f32.mxu0 %v1412_v0  ;;  %1254 = vmatpush1.bf16.msra.mxu0 %v1253_v45 }
  0x2c   :  { %1256 = vmatprep.subr.bf16.mxu0 %v1255_v46  ;;  %1165 = vmatmul.mubr.msk.f32.vlgmr.msra.gmra.mrb[0].mxu1 %vm45_vm0, %v1462_v27  ;;  %v266_v46 = vld [vmem:[#allocation2 + $0x68] sm:$0xff] }
  0x2d   :  { %1167 = vmatprep.mubr.msk.f32.mxu1 %vm45_vm0, %v28_v37 }
  0x2e   :  { %1103 = vmatmul.mubr.msk.f32.gmra.mrb[8].mxu0 %vm45_vm0, %v30_v51 }
  0x2f   :  { %158 = vmatprep.mubr.f32.mxu0 %v1412_v0  ;;  %1258 = vmatpush1.bf16.msra.mxu0 %v1257_v52  ;;  %v268_v52 = vld [vmem:[#allocation2 + $0x80] sm:$0xff] }
  0x30   :  { %1260 = vmatprep.subr.bf16.mxu0 %v1259_v53  ;;  %1168 = vmatmul.mubr.msk.f32.gmra.mrb[2].mxu1 %vm45_vm0, %v29_v44 }
  0x31   :  { %1170 = vmatprep.mubr.msk.f32.mxu1 %vm45_vm0, %v30_v51 }
  0x32   :  { %1104 = vmatmul.mubr.msk.f32.gmra.mrb[10].mxu0 %vm45_vm0, %v31_v58 }
  0x33   :  { %1262 = vmatpush1.bf16.msra.mxu0 %v1261_v59  ;;  %386 = vmatprep.mubr.f32.mxu0 %v1412_v0 }
  0x34   :  { %1264 = vmatprep.subr.bf16.mxu0 %v1263_v60  ;;  %1171 = vmatmul.mubr.msk.f32.gmra.mrb[4].mxu1 %vm45_vm0, %v31_v58  ;;  %v270_v60 = vld [vmem:[#allocation2 + $0x98] sm:$0xff] }
  0x37   :  { %1266 = vmatpush1.bf16.msra.mxu0 %v1265_v63  ;;  %v271_v63 = vld [vmem:[#allocation2 + $0xa0] sm:$0xff] }
  0x38   :  { %1268 = vmatprep.subr.bf16.mxu0 %v1267_v3 }
  0x3b   :  { %1270 = vmatpush1.bf16.msra.mxu0 %v1269_v9  ;;  %v273_v9 = vld [vmem:[#allocation2 + $0xb8] sm:$0xff] }
  0xf1   :  { %v130_v11 = vpop.f32.mrb[0].mxu0 }
  0xf2   :  { %v278_v12 = vadd.f32 %v260_v10, %v130_v11  ;;  %v132_v13 = vpop.f32.mrb[1].mxu0 }
  0xf4   :  { %v284_v15 = vmax.f32 %v278_v12, 0.0 }
  0xf5   :  { %v136_v16 = vpop.f32.mrb[2].mxu0 }
  0xf6   :  { %v279_v17 = vadd.f32 %v261_v14, %v136_v16  ;;  %v138_v18 = vpop.f32.mrb[3].mxu0  ;;  %387 = vmatmul.mubr.f32.vlgmr.msra.gmra.mrb[12].mxu0 %v284_v15  ;;  %v274_v15 = vld [vmem:[#allocation2 + $0xc8] sm:$0xff] }
  0xf7   :  { %392 = vmatprep.mubr.f32.mxu0 %v1412_v0 }
  0xf8   :  { %v285_v20 = vmax.f32 %v279_v17, 0.0 }
  0xf9   :  { %v142_v21 = vpop.f32.mrb[4].mxu0 }
  0xfa   :  { %v280_v22 = vadd.f32 %v262_v19, %v142_v21  ;;  %393 = vmatmul.mubr.f32.gmra.mrb[14].mxu0 %v285_v20  ;;  %v144_v23 = vpop.f32.mrb[5].mxu0 }
  0xfb   :  { %398 = vmatprep.mubr.f32.mxu0 %v1412_v0 }
  0xfc   :  { %v286_v25 = vmax.f32 %v280_v22, 0.0 }
  0xfd   :  { %v148_v26 = vpop.f32.mrb[6].mxu0 }
  0xfe   :  { %v281_v27 = vadd.f32 %v263_v24, %v148_v26  ;;  %399 = vmatmul.mubr.f32.gmra.mrb[16].mxu0 %v286_v25  ;;  %v150_v28 = vpop.f32.mrb[7].mxu0  ;;  %v519_v24 = vld [vmem:[#allocation2 + $0x270] sm:$0xff]  ;;  %v276_v26 = vld [vmem:[#allocation2 + $0xe0] sm:$0xff] }
  0xff   :  { %404 = vmatprep.mubr.f32.mxu0 %v1412_v0  ;;  %v1166_v40 = vpop.f32.mrb[0].mxu1 }
 0x100   :  { %v287_v30 = vmax.f32 %v281_v27, 0.0  ;;  %v231_v41 = vpop.f32.mrb[1].mxu1 }
 0x101   :  { %v154_v31 = vpop.f32.mrb[8].mxu0 }
 0x102   :  { %v282_v32 = vadd.f32 %v264_v29, %v154_v31  ;;  %405 = vmatmul.mubr.f32.gmra.mrb[18].mxu0 %v287_v30  ;;  %v1496_v33 = vpop.f32.mrb[9].mxu0  ;;  %v277_v31 = vld [vmem:[#allocation2 + $0xe8] sm:$0xff] }
 0x103   :  { %410 = vmatprep.mubr.f32.mxu0 %v1412_v0  ;;  %v1169_v42 = vpop.f32.mrb[2].mxu1 }
 0x104   :  { %v288_v35 = vmax.f32 %v282_v32, 0.0  ;;  %v241_v43 = vpop.f32.mrb[3].mxu1 }
 0x105   :  { %v160_v36 = vpop.f32.mrb[10].mxu0 }
 0x106   :  { %v283_v37 = vadd.f32 %v265_v34, %v160_v36  ;;  %411 = vmatmul.mubr.f32.gmra.mrb[20].mxu0 %v288_v35  ;;  %v1499_v38 = vpop.f32.mrb[11].mxu0 }
 0x107   :  { %416 = vmatprep.mubr.f32.mxu0 %v1412_v0  ;;  %v1502_v44 = vpop.f32.mrb[4].mxu1 }
 0x108   :  { %v289_v39 = vmax.f32 %v283_v37, 0.0  ;;  %v251_v45 = vpop.f32.mrb[5].mxu1 }
 0x10a   :  { %417 = vmatmul.mubr.f32.gmra.mrb[22].mxu0 %v289_v39 }
 0x1c9   :  { %v388_v48 = vpop.f32.mrb[12].mxu0 }
 0x1ca   :  { %v389_v49 = vadd.f32 %v388_v48, %v266_v46  ;;  %v390_v50 = vpop.f32.mrb[13].mxu0 }
 0x1cb   :  { %v391_v51 = vadd.f32 %v390_v50, %v267_v47 }
 0x1cc   :  { %v423_v53 = vmul.f32 %v389_v49, %v132_v13 }
 0x1cd   :  { %v429_v55 = vmul.f32 %v391_v51, %v231_v41  ;;  %v394_v56 = vpop.f32.mrb[14].mxu0 }
 0x1ce   :  { %v395_v57 = vadd.f32 %v394_v56, %v268_v52  ;;  %v396_v58 = vpop.f32.mrb[15].mxu0  ;;  %v1415_v52 = vmov 0  }
 0x1cf   :  { %v397_v59 = vadd.f32 %v396_v58, %v269_v54  ;;  %v435_v61 = vadd.f32 %v429_v55, %v423_v53  ;;  %1314 = vset.pattern.permute.xlu0 %v1415_v52  ;;  %v1416_v53 = vmov 1  }
 0x1d0   :  { %v424_v62 = vmul.f32 %v395_v57, %v138_v18  ;;  %v275_v18 = vld [vmem:[#allocation2 + $0xd0] sm:$0xff]  ;;  %1313 = vset.pattern.permute.xlu1 %v1416_v53 }
 0x1d1   :  { %v430_v1 = vmul.f32 %v1166_v40, %v397_v59  ;;  %v400_v2 = vpop.f32.mrb[16].mxu0  ;;  %447 = vrot.lane.b32.xlu0 %v435_v61, %s1413_s6 }
 0x1d2   :  { %v401_v3 = vadd.f32 %v400_v2, %v270_v60  ;;  %v402_v4 = vpop.f32.mrb[17].mxu0 }
 0x1d3   :  { %v403_v5 = vadd.f32 %v402_v4, %v271_v63  ;;  %v436_v7 = vadd.f32 %v430_v1, %v424_v62 }
 0x1d4   :  { %v425_v8 = vmul.f32 %v401_v3, %v144_v23  ;;  %v520_v23 = vld [vmem:[#allocation2 + $0x288] sm:$0xff] }
 0x1d5   :  { %v431_v10 = vmul.f32 %v403_v5, %v241_v43  ;;  %v406_v11 = vpop.f32.mrb[18].mxu0  ;;  %449 = vrot.lane.b32.xlu0 %v436_v7, %s1413_s6  ;;  %v1271_v29 = vpack.c.bf16 %v520_v23, %v519_v24 }
 0x1d6   :  { %v407_v12 = vadd.f32 %v406_v11, %v272_v6  ;;  %v408_v13 = vpop.f32.mrb[19].mxu0 }
 0x1d7   :  { %v409_v14 = vadd.f32 %v408_v13, %v273_v9  ;;  %v437_v16 = vadd.f32 %v431_v10, %v425_v8  ;;  %1272 = vmatprep.subr.bf16.mxu1 %v1271_v29 }
 0x1d8   :  { %v426_v17 = vmul.f32 %v407_v12, %v150_v28  ;;  %1274 = vmatpush3.bf16.msra.mxu1 %v1271_v29 }
 0x1d9   :  { %v432_v19 = vmul.f32 %v1169_v42, %v409_v14  ;;  %v412_v20 = vpop.f32.mrb[20].mxu0  ;;  %451 = vrot.lane.b32.xlu1 %v437_v16, %s1413_s6  ;;  %v522_v42 = vld [vmem:[#allocation2 + $0x2b8] sm:$0xff] }
 0x1da   :  { %v413_v21 = vadd.f32 %v412_v20, %v274_v15  ;;  %v414_v22 = vpop.f32.mrb[21].mxu0 }
 0x1db   :  { %v415_v25 = vadd.f32 %v414_v22, %v275_v18  ;;  %v438_v27 = vadd.f32 %v432_v19, %v426_v17 }
 0x1dc   :  { %v427_v30 = vmul.f32 %v413_v21, %v1496_v33  ;;  %v521_v33 = vld [vmem:[#allocation2 + $0x2a0] sm:$0xff] }
 0x1dd   :  { %v433_v32 = vmul.f32 %v415_v25, %v251_v45  ;;  %v418_v34 = vpop.f32.mrb[22].mxu0  ;;  %453 = vrot.lane.b32.xlu1 %v438_v27, %s1413_s6  ;;  %v1275_v43 = vpack.c.bf16 %v522_v42, %v521_v33  ;;  %v639_v33 = vld [vmem:[#allocation2 + $0x318] sm:$0xff] }
 0x1de   :  { %v419_v28 = vadd.f32 %v418_v34, %v276_v26  ;;  %v420_v35 = vpop.f32.mrb[23].mxu0  ;;  %v636_v26 = vld [vmem:[#allocation2 + $0x3da] ss:$0 sm:$0xff]  ;;  %v1417_v34 = vmov 0.0|0.0  }
 0x1df   :  { %v439_v36 = vadd.f32 %v433_v32, %v427_v30  ;;  %v421_v37 = vadd.f32 %v420_v35, %v277_v31  ;;  %1276 = vmatprep.subr.bf16.mxu1 %v1275_v43  ;;  %v637_v32 = vld [vmem:[#allocation2 + $0x2e8] sm:$0xff] }
 0x1e0   :  { %v428_v39 = vmul.f32 %v419_v28, %v1499_v38  ;;  %1278 = vmatpush3.bf16.msra.mxu1 %v1275_v43  ;;  %v640_v43 = vld [vmem:[#allocation2 + $0x330] sm:$0xff] }
 0x1e1   :  { %v434_v40 = vmul.f32 %v1502_v44, %v421_v37  ;;  %455 = vrot.lane.b32.xlu0 %v439_v36, %s1413_s6  ;;  %1279 = vmatprep.subr.bf16.mxu1 %v1417_v34 }
 0x1e3   :  { %v440_v41 = vadd.f32 %v434_v40, %v428_v39 }
 0x1e5   :  { %457 = vrot.lane.b32.xlu1 %v440_v41, %s1413_s6 }
 0x243   :  { %v448_v45 = vpop.permute.xlu0 %447 }
 0x244   :  { %v465_v46 = vadd.f32 %v448_v45, %v435_v61 }
 0x246   :  { %477 = vrot.lane.b32.xlu0 %v465_v46, %s1414_s7 }
 0x247   :  { %v450_v47 = vpop.permute.xlu0 %449 }
 0x248   :  { %v466_v48 = vadd.f32 %v450_v47, %v436_v7 }
 0x24a   :  { %479 = vrot.lane.b32.xlu1 %v466_v48, %s1414_s7 }
 0x24b   :  { %v452_v38 = vpop.permute.xlu1 %451 }
 0x24c   :  { %v467_v44 = vadd.f32 %v452_v38, %v437_v16 }
 0x24e   :  { %481 = vrot.lane.b32.xlu0 %v467_v44, %s1414_s7 }
 0x24f   :  { %v454_v49 = vpop.permute.xlu1 %453 }
 0x250   :  { %v468_v50 = vadd.f32 %v454_v49, %v438_v27 }
 0x252   :  { %483 = vrot.lane.b32.xlu1 %v468_v50, %s1414_s7 }
 0x253   :  { %v456_v51 = vpop.permute.xlu0 %455 }
 0x254   :  { %v469_v54 = vadd.f32 %v456_v51, %v439_v36  ;;  %v638_v36 = vld [vmem:[#allocation2 + $0x300] sm:$0xff] }
 0x256   :  { %485 = vrot.lane.b32.xlu0 %v469_v54, %s1414_s7 }
 0x257   :  { %v458_v55 = vpop.permute.xlu1 %457 }
 0x258   :  { %v470_v56 = vadd.f32 %v458_v55, %v440_v41 }
 0x25a   :  { %487 = vrot.lane.b32.xlu1 %v470_v56, %s1414_s7 }
 0x2b8   :  { %v478_v57 = vpop.permute.xlu0 %477 }
 0x2b9   :  { %v1520_v58 = vadd.f32 %v478_v57, %v465_v46 }
 0x2bb   :  { %vm501_vm1 = vcmp.gt.f32.partialorder %v1520_v58, 0.0  ;;  %v507_v59 = vmul.f32 0.2, %v1520_v58 }
 0x2bc   :  { %v480_v60 = vpop.permute.xlu1 %479 }
 0x2bd   :  { %v1524_v61 = vadd.f32 %v480_v60, %v466_v48  ;;  %v513_v62 = vsel %vm501_vm1, %v1520_v58, %v507_v59  ;;  %v642_v60 = vld [vmem:[#allocation2 + $0x360] sm:$0xff] }
 0x2be   :  { %1181 = vmatprep.mubr.msk.f32.mxu1 %vm45_vm0, %v513_v62 }
 0x2bf   :  { %vm502_vm2 = vcmp.gt.f32.partialorder %v1524_v61, 0.0  ;;  %v508_v63 = vmul.f32 0.2, %v1524_v61 }
 0x2c0   :  { %v482_v1 = vpop.permute.xlu0 %481 }
 0x2c1   :  { %v1530_v2 = vadd.f32 %v482_v1, %v467_v44  ;;  %v514_v3 = vsel %vm502_vm2, %v1524_v61, %v508_v63  ;;  %v641_v1 = vld [vmem:[#allocation2 + $0x348] sm:$0xff] }
 0x2c2   :  { %1182 = vmatmul.mubr.msk.f32.vlgmr.msra.gmra.mrb[6].mxu1 %vm45_vm0, %v514_v3 }
 0x2c3   :  { %vm503_vm3 = vcmp.gt.f32.partialorder %v1530_v2, 0.0  ;;  %v509_v4 = vmul.f32 0.2, %v1530_v2 }
 0x2c4   :  { %v484_v5 = vpop.permute.xlu1 %483 }
 0x2c5   :  { %v1536_v6 = vadd.f32 %v484_v5, %v468_v50  ;;  %v515_v7 = vsel %vm503_vm3, %v1530_v2, %v509_v4 }
 0x2c6   :  { %1184 = vmatprep.mubr.msk.f32.mxu1 %vm45_vm0, %v515_v7 }
 0x2c7   :  { %vm504_vm4 = vcmp.gt.f32.partialorder %v1536_v6, 0.0  ;;  %v510_v8 = vmul.f32 0.2, %v1536_v6 }
 0x2c8   :  { %v486_v9 = vpop.permute.xlu0 %485 }
 0x2c9   :  { %v1542_v10 = vadd.f32 %v486_v9, %v469_v54  ;;  %v516_v11 = vsel %vm504_vm4, %v1536_v6, %v510_v8 }
 0x2ca   :  { %1185 = vmatmul.mubr.msk.f32.gmra.mrb[8].mxu1 %vm45_vm0, %v516_v11 }
 0x2cb   :  { %vm505_vm5 = vcmp.gt.f32.partialorder %v1542_v10, 0.0  ;;  %v511_v12 = vmul.f32 0.2, %v1542_v10 }
 0x2cc   :  { %v488_v13 = vpop.permute.xlu1 %487 }
 0x2cd   :  { %v1548_v14 = vadd.f32 %v488_v13, %v470_v56  ;;  %v517_v15 = vsel %vm505_vm5, %v1542_v10, %v511_v12 }
 0x2ce   :  { %1187 = vmatprep.mubr.msk.f32.mxu1 %vm45_vm0, %v517_v15 }
 0x2cf   :  { %vm506_vm6 = vcmp.gt.f32.partialorder %v1548_v14, 0.0  ;;  %v512_v16 = vmul.f32 0.2, %v1548_v14 }
 0x2d1   :  { %v518_v17 = vsel %vm506_vm6, %v1548_v14, %v512_v16 }
 0x2d2   :  { %1188 = vmatmul.mubr.msk.f32.gmra.mrb[10].mxu1 %vm45_vm0, %v518_v17 }
 0x2d3   :  { %1202 = vmatprep.mubr.msk.f32.mxu1 %vm1419_vm7, %v1412_v0 }
 0x395   :  { %v1183_v18 = vpop.f32.mrb[6].mxu1 }
 0x396   :  { %690 = vperm.xlu0 %1314, %v1183_v18   ;;  %650 = vperm.xlu1 %1313, %v1183_v18   ;;  %v607_v19 = vpop.f32.mrb[7].mxu1 }
 0x39a   :  { %1315 = vset.pattern.permute.xlu0 %v1416_v53  ;;  %1316 = vset.pattern.permute.xlu1 %v1415_v52 }
 0x39b   :  { %686 = vperm.xlu1 %1316, %v607_v19   ;;  %645 = vperm.xlu0 %1315, %v607_v19  }
 0x39d   :  { %v1186_v20 = vpop.f32.mrb[8].mxu1 }
 0x39e   :  { %v617_v21 = vpop.f32.mrb[9].mxu1 }
 0x39f   :  { %1317 = vset.pattern.permute.xlu1 %v1416_v53  ;;  %1320 = vset.pattern.permute.xlu0 %v1415_v52 }
 0x3a0   :  { %660 = vperm.xlu1 %1317, %v1186_v20   ;;  %694 = vperm.xlu0 %1320, %v617_v21  }
 0x3a4   :  { %1318 = vset.pattern.permute.xlu1 %v1415_v52  ;;  %1321 = vset.pattern.permute.xlu0 %v1416_v53 }
 0x3a5   :  { %698 = vperm.xlu1 %1318, %v1186_v20   ;;  %v1189_v22 = vpop.f32.mrb[10].mxu1 }
 0x3a6   :  { %v627_v24 = vpop.f32.mrb[11].mxu1 }
 0x3a7   :  { %665 = vperm.xlu0 %1321, %v627_v24  }
 0x3a9   :  { %1319 = vset.pattern.permute.xlu1 %v1416_v53 }
 0x3aa   :  { %655 = vperm.xlu1 %1319, %v617_v21  }
 0x3ab   :  { %1323 = vset.pattern.permute.xlu0 %v1415_v52 }
 0x3ac   :  { %706 = vperm.xlu0 %1323, %v1189_v22  }
 0x3ae   :  { %670 = vperm.xlu1 %1319, %v1189_v22  }
 0x3b2   :  { %1322 = vset.pattern.permute.xlu1 %v1415_v52 }
 0x3b3   :  { %702 = vperm.xlu1 %1322, %v627_v24  }
 0x415   :  { %v651_v23 = vpop.permute.xlu1 %650  ;;  %v691_v25 = vpop.permute.xlu0 %690 }
 0x416   :  { %v674_v27 = vadd.f32 %v651_v23, %v636_v26  ;;  %v710_v41 = vmul.f32 %v691_v25, %v638_v36 }
 0x418   :  { %v680_v28 = vmul.f32 %v674_v27, %v1524_v61 }
 0x41a   :  { %v687_v29 = vpop.permute.xlu1 %686  ;;  %v646_v30 = vpop.permute.xlu0 %645 }
 0x41b   :  { %v673_v31 = vadd.f32 %v646_v30, %v636_v26  ;;  %v709_v37 = vmul.f32 %v687_v29, %v637_v32 }
 0x41d   :  { %v679_v35 = vmul.f32 %v673_v31, %v1520_v58  ;;  %v1329_v45 = vpack.i.bf16 %v710_v41, %v709_v37 }
 0x41f   :  { %v661_v39 = vpop.permute.xlu1 %660  ;;  %v1324_v40 = vpack.i.bf16 %v680_v28, %v679_v35  ;;  %v695_v42 = vpop.permute.xlu0 %694 }
 0x420   :  { %v711_v47 = vmul.f32 %v695_v42, %v639_v33  ;;  %v676_v44 = vadd.f32 %v661_v39, %v636_v26  ;;  %v776_v42 = vld [vmem:[#allocation2 + $0x2d0] sm:$0xff] }
 0x421   :  { %1325 = vrot.lane.b32.xlu1 %v1324_v40, %s1418_s8 }
 0x422   :  { %v682_v52 = vmul.f32 %v676_v44, %v1536_v6  ;;  %v871_v44 = vld [vmem:[#allocation2 + $0x3c0] sm:$0xff] }
 0x424   :  { %v699_v46 = vpop.permute.xlu1 %698 }
 0x425   :  { %v712_v48 = vmul.f32 %v699_v46, %v640_v43  ;;  %1330 = vrot.lane.b32.xlu1 %v1329_v45, %s1413_s6  ;;  %v1420_v43 = vmov 64   ;;  %v868_v45 = vld [vmem:[#allocation2 + $0x378] sm:$0xff] }
 0x426   :  { %v666_v49 = vpop.permute.xlu0 %665  ;;  %1354 = vset.pattern.permute.xlu0 %v1420_v43 }
 0x427   :  { %v1334_v38 = vpack.i.bf16 %v712_v48, %v711_v47  ;;  %v677_v53 = vadd.f32 %v666_v49, %v636_v26 }
 0x429   :  { %v656_v50 = vpop.permute.xlu1 %655  ;;  %1335 = vrot.lane.b32.xlu1 %v1334_v38, %s1413_s6  ;;  %v683_v59 = vmul.f32 %v677_v53, %v1542_v10  ;;  %v870_v38 = vld [vmem:[#allocation2 + $0x3a8] sm:$0xff] }
 0x42a   :  { %v675_v51 = vadd.f32 %v656_v50, %v636_v26  ;;  %v1292_v49 = vpack.c.bf16 %v871_v44, %v870_v38  ;;  %v864_v50 = vlaneseq }
 0x42b   :  { %v707_v62 = vpop.permute.xlu0 %706 }
 0x42c   :  { %v681_v54 = vmul.f32 %v675_v51, %v1530_v2  ;;  %v714_v5 = vmul.f32 %v707_v62, %v642_v60 }
 0x42d   :  { %v671_v55 = vpop.permute.xlu1 %670 }
 0x42e   :  { %v678_v56 = vadd.f32 %v671_v55, %v636_v26  ;;  %v1339_v57 = vpack.i.bf16 %v682_v52, %v681_v54  ;;  %v865_v52 = vand.u32 127, %v864_v50 }
 0x430   :  { %v684_v63 = vmul.f32 %v678_v56, %v1548_v14  ;;  %1340 = vrot.lane.b32.xlu0 %v1339_v57, %s1418_s8  ;;  %v32_v56 = vld [vmem:[%s1633_s0 + $0x30] sm:$0xff]  ;;  %vm866_vm10 = vcmp.lt.s32.totalorder %v865_v52, 16  ;;  %s1423_s0 = smov 112  }
 0x432   :  { %v703_v3 = vpop.permute.xlu1 %702  ;;  %v1344_v4 = vpack.i.bf16 %v684_v63, %v683_v59 }
 0x433   :  { %v713_v7 = vmul.f32 %v703_v3, %v641_v1 }
 0x434   :  { %1345 = vrot.lane.b32.xlu0 %v1344_v4, %s1418_s8 }
 0x435   :  { %v1349_v8 = vpack.i.bf16 %v714_v5, %v713_v7 }
 0x437   :  { %1350 = vrot.lane.b32.xlu1 %v1349_v8, %s1413_s6 }
 0x493   :  { %v1326_v9 = vpop.permute.xlu1 %1325 }
 0x494   :  { %v1328_v11 = vunpack.i.h.bf16 %v1326_v9  ;;  %v1327_v12 = vunpack.i.l.bf16 %v1326_v9 }
 0x496   :  { %v764_v17 = vsel %vm45_vm0, %v1524_v61, %v1328_v11  ;;  %v763_v18 = vsel %vm45_vm0, %v1520_v58, %v1327_v12 }
 0x497   :  { %v1331_v13 = vpop.permute.xlu1 %1330 }
 0x498   :  { %v1333_v15 = vunpack.i.h.bf16 %v1331_v13  ;;  %v1332_v16 = vunpack.i.l.bf16 %v1331_v13  ;;  %v975_v13 = vld [vmem:[#allocation2 + $0x3f0] sm:$0xff] }
 0x49a   :  { %v770_v19 = vsel %vm769_vm8, %v763_v18, %v1332_v16  ;;  %v771_v20 = vsel %vm769_vm8, %v764_v17, %v1333_v15  ;;  %v976_v15 = vld [vmem:[#allocation2 + $0x408] sm:$0xff] }
 0x49b   :  { %v1280_v21 = vpack.c.bf16 %v771_v20, %v770_v19  ;;  %v1336_v22 = vpop.permute.xlu1 %1335  ;;  %v1295_v16 = vpack.c.bf16 %v976_v15, %v975_v13 }
 0x49c   :  { %v1338_v26 = vunpack.i.h.bf16 %v1336_v22  ;;  %v1337_v27 = vunpack.i.l.bf16 %v1336_v22 }
 0x49d   :  { %1281 = vmatpush3.bf16.msra.mxu1 %v1280_v21 }
 0x49e   :  { %1282 = vmatprep.subr.bf16.mxu1 %v1417_v34 }
 0x4a2   :  { %v1341_v24 = vpop.permute.xlu0 %1340 }
 0x4a3   :  { %v1343_v23 = vunpack.i.h.bf16 %v1341_v24  ;;  %v1342_v25 = vunpack.i.l.bf16 %v1341_v24 }
 0x4a5   :  { %v766_v61 = vsel %vm45_vm0, %v1536_v6, %v1343_v23  ;;  %v765_v58 = vsel %vm45_vm0, %v1530_v2, %v1342_v25 }
 0x4a6   :  { %v1346_v29 = vpop.permute.xlu0 %1345  ;;  %v772_v30 = vsel %vm769_vm8, %v765_v58, %v1337_v27  ;;  %v773_v31 = vsel %vm769_vm8, %v766_v61, %v1338_v26 }
 0x4a7   :  { %v1348_v32 = vunpack.i.h.bf16 %v1346_v29  ;;  %v1347_v28 = vunpack.i.l.bf16 %v1346_v29  ;;  %v1283_v35 = vpack.c.bf16 %v773_v31, %v772_v30 }
 0x4a9   :  { %v1351_v36 = vpop.permute.xlu1 %1350  ;;  %1284 = vmatpush3.bf16.msra.mxu1 %v1283_v35  ;;  %v768_v6 = vsel %vm45_vm0, %v1548_v14, %v1348_v32  ;;  %v767_v2 = vsel %vm45_vm0, %v1542_v10, %v1347_v28  ;;  %v869_v10 = vld [vmem:[#allocation2 + $0x390] sm:$0xff] }
 0x4aa   :  { %v1353_v37 = vunpack.i.h.bf16 %v1351_v36  ;;  %v1352_v39 = vunpack.i.l.bf16 %v1351_v36  ;;  %1285 = vmatprep.subr.bf16.mxu1 %v1417_v34  ;;  %v1289_v48 = vpack.c.bf16 %v869_v10, %v868_v45  ;;  %v977_v36 = vld [vmem:[#allocation2 + $0x3d9] ss:$0 sm:$0xff] }
 0x4ac   :  { %v774_v40 = vsel %vm769_vm8, %v767_v2, %v1352_v39  ;;  %v775_v41 = vsel %vm769_vm8, %v768_v6, %v1353_v37 }
 0x4ad   :  { %v1286_v33 = vpack.c.bf16 %v775_v41, %v774_v40 }
 0x4af   :  { %1287 = vmatpush3.bf16.msra.mxu1 %v1286_v33 }
 0x4b0   :  { %1288 = vmatprep.subr.bf16.mxu1 %v1417_v34 }
 0x4b2   :  { %1203 = vmatmul.mubr.msk.f32.vlgmr.msra.gmra.mrb[12].mxu1 %vm777_vm9, %v776_v42 }
 0x4b3   :  { %1213 = vmatprep.mubr.msk.f32.mxu1 %vm1419_vm7, %v1412_v0  ;;  %1290 = vmatpush3.bf16.msra.mxu1 %v1289_v48 }
 0x4b4   :  { %1291 = vmatprep.subr.bf16.mxu1 %v1417_v34 }
 0x4b7   :  { %1293 = vmatpush3.bf16.msra.mxu1 %v1292_v49 }
 0x4b8   :  { %1294 = vmatprep.subr.bf16.mxu1 %v1417_v34  ;;  %v872_v34 = vld [vmem:[#allocation2 + $0x3d8] ss:$0 sm:$0xff] }
 0x585   :  { %v1599_v14 = vpop.f32.mrb[12].mxu1 }
 0x586   :  { %v1204_v46 = vpop.f32.mrb[13].mxu1  ;;  %859 = vrot.lane.b32.xlu1 %v1599_v14, %s1414_s7  ;;  %v851_v47 = vmul.f32 0.14285715, %v1599_v14 }
 0x588   :  { %854 = vperm.xlu0 %1354, %v851_v47  }
 0x5f8   :  { %v860_v54 = vpop.permute.xlu1 %859 }
 0x607   :  { %v855_v51 = vpop.permute.xlu0 %854 }
 0x608   :  { %v857_v53 = vmul.f32 %v855_v51, %v1599_v14 }
 0x60a   :  { %v862_v55 = vadd.f32 %v860_v54, %v857_v53 }
 0x60c   :  { %v863_v57 = vmax.f32 %v862_v55, 0.0 }
 0x60e   :  { %v867_v59 = vsel %vm866_vm10, %v863_v57, %v32_v56 }
 0x60f   :  { %1214 = vmatmul.mubr.msk.f32.vlgmr.msra.gmra.mrb[14].mxu1 %vm45_vm0, %v867_v59 }
 0x610   :  { %1220 = vmatprep.mubr.msk.f32.mxu1 %vm1419_vm7, %v1412_v0  ;;  %1296 = vmatpush3.bf16.msra.mxu1 %v1295_v16 }
 0x6e2   :  { %v942_v60 = vpop.f32.mrb[14].mxu1 }
 0x6e3   :  { %v943_v62 = vadd.f32 %v942_v60, %v872_v34  ;;  %v1215_v63 = vpop.f32.mrb[15].mxu1 }
 0x6e5   :  { %957 = vrot.lane.b32.xlu0 %v943_v62, %s1421_s11  ;;  %947 = vrot.lane.b32.xlu1 %v943_v62, %s1422_s12 }
 0x757   :  { %v948_v1 = vpop.permute.xlu1 %947  ;;  %v958_v9 = vpop.permute.xlu0 %957 }
 0x758   :  { %v950_v3 = vadd.f32 %v948_v1, %v943_v62 }
 0x75a   :  { %v1119_v4 = vmul.f32 -1.442695, %v950_v3 }
 0x75c   :  { %1355 = vpow2.f32 %v1119_v4 }
 0x766   :  { %v1356_v5 = vpop.eup %1355 }
 0x767   :  { %v954_v7 = vadd.f32 1.0, %v1356_v5 }
 0x769   :  { %1357 = vrcp.f32 %v954_v7 }
 0x773   :  { %v1358_v8 = vpop.eup %1357 }
 0x774   :  { %v960_v11 = vmul.f32 %v1358_v8, %v958_v9  ;;  %v967_v18 = vsub.f32 1.0, %v1358_v8  ;;  %v973_v20 = vmul.f32 %v1358_v8, %v32_v56 }
 0x776   :  { %962 = vrot.lane.b32.xlu1 %v960_v11, %s1418_s8 }
 0x7e8   :  { %v963_v0 = vpop.permute.xlu1 %962 }
 0x7e9   :  { %v965_v12 = vadd.f32 %v963_v0, %v943_v62 }
 0x7eb   :  { %1359 = vtanh.f32 %v965_v12 }
 0x7f5   :  { %v1360_v17 = vpop.eup %1359 }
 0x7f6   :  { %969 = vrot.lane.b32.xlu0 %v1360_v17, %s1423_s0 }
 0x868   :  { %v970_v19 = vpop.permute.xlu0 %969 }
 0x869   :  { %v972_v21 = vmul.f32 %v970_v19, %v967_v18 }
 0x86b   :  { %v974_v22 = vadd.f32 %v973_v20, %v972_v21 }
 0x86d   :  { %979 = vrot.lane.b32.xlu1 %v974_v22, %s1423_s0  ;;  %v1054_v24 = vmul.f32 %v974_v22, %v1599_v14  ;;  %v1062_v23 = vmul.f32 %v974_v22, %v860_v54 }
 0x86f   :  { %1056 = vrot.lane.b32.xlu0 %v1054_v24, %s1423_s0 }
 0x871   :  { %1064 = vrot.lane.b32.xlu1 %v1062_v23, %s1423_s0 }
 0x8df   :  { %v980_v25 = vpop.permute.xlu1 %979 }
 0x8e0   :  { %1221 = vmatmul.mubr.msk.f32.vlgmr.msra.gmra.mrb[16].mxu1 %vm981_vm11, %v980_v25 }
 0x8e1   :  { %v1057_v26 = vpop.permute.xlu0 %1056 }
 0x8e2   :  { %v1059_v27 = vsel %vm981_vm11, %v1057_v26, 0.0 }
 0x8e3   :  { %v1065_v61 = vpop.permute.xlu1 %1064  ;;  %1060 = vadd.xlane.f32.xlu0 %v1059_v27 }
 0x8e4   :  { %v1067_v58 = vsel %vm981_vm11, %v1065_v61, 0.0 }
 0x8e5   :  { %1068 = vadd.xlane.f32.xlu1 %v1067_v58 }
 0x8f6   :  { %1076 = vrot.lane.b32.xlu1 %v974_v22, %s1421_s11 }
 0x970   :  { %v1061_v29 = vpop.xlane.xlu0 %1060 }
 0x971   :  { %v1070_v30 = vmul.f32 %v1061_v29, %v1599_v14 }
 0x972   :  { %v1069_v31 = vpop.xlane.xlu1 %1068 }
 0x973   :  { %v1071_v32 = vadd.f32 %v1070_v30, %v1069_v31 }
 0x975   :  { %1073 = vrot.lane.b32.xlu0 %v1071_v32, %s1413_s6 }
 0x976   :  { %v1077_v6 = vpop.permute.xlu1 %1076 }
 0x9b3   :  { %v1050_v28 = vpop.f32.mrb[16].mxu1 }
 0x9b4   :  { %v1222_v35 = vpop.f32.mrb[17].mxu1  ;;  %v1051_v37 = vadd.f32 %v1050_v28, %v977_v36 }
 0x9e7   :  { %v1074_v39 = vpop.permute.xlu0 %1073 }
 0x9e8   :  { %v1079_v2 = vsel %vm45_vm0, %v1051_v37, %v1074_v39 }
 0x9e9   :  { %v1080_v40 = vsel %vm769_vm8, %v1079_v2, %v1077_v6 }
 0x9ea   :  { %v1082_v41 = vsel %vm1081_vm12, %v1080_v40, 0.0 }
 0x9eb   :  { %1083 = vst [vmem:[#allocation5] sm:$0xff] %v1082_v41 }
 0x9ec   :  { %1394 = shalt.err (!%p1391_p12)
}
 0x9ed   :  { %s1395_s18 = scalar_lea.hbm %s1635_s2, 128 }
 0x9ee   :  { %p1396_p13 = scmp.ne.s32.totalorder %s1635_s2, %s1395_s18  ;;  %p1399_p0 = scmp.lt.u32.totalorder %s1395_s18, %s1635_s2 }
 0x9f0   :  { %p1401_p1 = pnand %p1399_p0, %p1396_p13 }
 0x9f2   :  { %1404 = shalt.err (!%p1401_p1)
}
 0x9f3   :  { %1093 = dma.vmem_to_hbm [thread:$0]  %s1091_s14, 128, %s1635_s2, [#allocation4]  }
 0x9f4   :  { %1407 = dma.done.wait [#allocation4], 128  }
 0x9f5   :  { %1408 = vsyncadd [#allocation4], 4294967168 }
 0x9f6   :  { %1097 = vsyncpa [#allocation3], 1 }
 0x9f7   :  { %1098 = vsyncpa [#allocation4], 1 }

</bundles_post_ra>
